<compile_context>
chip_gen: v6e
topology: v6e:2x2x1
jax: 0.10.0
libtpu: 0.0.40
codegen_flags: <defaults>
</compile_context>

<pallas_src>
import functools

import jax
import jax.numpy as jnp
from jax import lax
from jax.experimental import pallas as pl
from jax.experimental.pallas import tpu as pltpu

# Activations: tanh/softplus hit the EUP slot, ReLU the VPU slot -- all effectively free
# in the MXU shadow at these widths, so no accuracy/speed trade is made here.
ACT_MAP = {
    "Tanh": jnp.tanh,
    "ReLU": lambda x: jnp.maximum(x, 0.0),
    "Softplus": lambda x: jnp.logaddexp(x, 0.0),  # matches torch Softplus(beta=1)
}

_LANE = 128


def _round_up(x, m):
    return ((x + m - 1) // m) * m


def _num_tensorcores_per_chip():
    """Megacore chips (2 TensorCores behind one JAX device): v4, v5p, v7x."""
    try:
        kind = jax.devices()[0].device_kind.lower()
    except Exception:
        return 1
    if any(tag in kind for tag in ("v4", "v5p", "v7", "7x")):
        return 2
    return 1


def _auto_bm(batch, sublane):
    """Batch tile: one big tile on single-TC chips; >=2 parallel tiles on megacore chips."""
    n_tc = _num_tensorcores_per_chip()
    cap = 512 if n_tc > 1 else 1024  # smaller cap on 2-TC v7x (64 MiB VMEM, want >=2 steps)
    b = _round_up(max(batch, 1), sublane)
    if n_tc > 1 and b > sublane:
        b = _round_up(pl.cdiv(b, n_tc), sublane)
    return min(cap, b)


def _make_kernel(act_type, n_hidden_layers, compute_dtype):
    act = ACT_MAP[act_type]
    cdt = jnp.dtype(compute_dtype)

    if n_hidden_layers == 0:
        # n_layer == 1: no hidden layers, no dummy hidden block DMA'd.
        def kernel0(x_ref, w_in_ref, b_in_ref, w_out_ref, b_out_ref, o_ref):
            h = jnp.dot(x_ref[...].astype(cdt), w_in_ref[...],
                        preferred_element_type=jnp.float32) + b_in_ref[...]
            h = act(h)
            out = jnp.dot(h.astype(cdt), w_out_ref[...],
                          preferred_element_type=jnp.float32) + b_out_ref[...]
            o_ref[...] = out.astype(o_ref.dtype)
        return kernel0

    def kernel(x_ref, w_in_ref, b_in_ref, w_hid_ref, b_hid_ref,
               w_out_ref, b_out_ref, o_ref):
        # fc_in + activation (f32 MXU accumulate, f32 bias add, f32 activation)
        h = jnp.dot(x_ref[...].astype(cdt), w_in_ref[...],
                    preferred_element_type=jnp.float32) + b_in_ref[...]
        h = act(h)
        if n_hidden_layers <= 4:
            # Small static unroll: fine for vreg pressure.
            for l in range(n_hidden_layers):
                h = act(jnp.dot(h.astype(cdt), w_hid_ref[l],
                                preferred_element_type=jnp.float32) + b_hid_ref[l])
        else:
            # Deep nets: bound the live range to one layer's h + weight tile.
            def body(l, h_carry):
                return act(jnp.dot(h_carry.astype(cdt), w_hid_ref[l],
                                   preferred_element_type=jnp.float32) + b_hid_ref[l])
            h = lax.fori_loop(0, n_hidden_layers, body, h)
        # fc_out (no activation)
        out = jnp.dot(h.astype(cdt), w_out_ref[...],
                      preferred_element_type=jnp.float32) + b_out_ref[...]
        o_ref[...] = out.astype(o_ref.dtype)

    return kernel


def init_ode_func_params(key, input_dim, n_hidden, n_layer, output_dim=None,
                         dtype=jnp.float32):
    """nn.Linear-style init (U[-1/sqrt(fan_in), 1/sqrt(fan_in)]), weights stored [in, out]."""
    output_dim = input_dim if output_dim is None else output_dim
    n_hidden_layers = max(n_layer - 1, 0)
    keys = jax.random.split(key, 6)

    def uni(k, shape, fan_in):
        bound = 1.0 / jnp.sqrt(jnp.asarray(fan_in, dtype))
        return jax.random.uniform(k, shape, dtype, -bound, bound)

    w_in = uni(keys[0], (input_dim, n_hidden), input_dim)
    b_in = uni(keys[1], (1, n_hidden), input_dim)
    w_hid = uni(keys[2], (n_hidden_layers, n_hidden, n_hidden), n_hidden)
    b_hid = uni(keys[3], (n_hidden_layers, 1, n_hidden), n_hidden)
    w_out = uni(keys[4], (n_hidden, output_dim), n_hidden)
    b_out = uni(keys[5], (1, output_dim), n_hidden)
    return (w_in, b_in, w_hid, b_hid, w_out, b_out)


def prepare_ode_func_params(params, compute_dtype=jnp.float32):
    """One-time parameter prep (call ONCE, outside the ODE solver loop).

    Pads the hidden width H to a 128-lane multiple (zero padding, mathematically exact),
    casts matmul operands to `compute_dtype`, keeps biases in f32, and stacks the hidden
    layers.  Input/output feature dims are left untouched.
    """
    cdt = jnp.dtype(compute_dtype)
    f32 = jnp.float32
    w_in, b_in, w_hid, b_hid, w_out, b_out = params
    D, H = w_in.shape
    O = w_out.shape[1]
    L = w_hid.shape[0]
    Hp = _round_up(H, _LANE)

    w_in_p = jnp.pad(w_in.astype(cdt), ((0, 0), (0, Hp - H)))
    b_in_p = jnp.pad(b_in.reshape(1, H).astype(f32), ((0, 0), (0, Hp - H)))
    w_out_p = jnp.pad(w_out.astype(cdt), ((0, Hp - H), (0, 0)))
    b_out_p = b_out.reshape(1, O).astype(f32)
    if L == 0:
        return (w_in_p, b_in_p, w_out_p, b_out_p)
    w_hid_p = jnp.pad(w_hid.astype(cdt), ((0, 0), (0, Hp - H), (0, Hp - H)))
    b_hid_p = jnp.pad(b_hid.reshape(L, 1, H).astype(f32), ((0, 0), (0, 0), (0, Hp - H)))
    return (w_in_p, b_in_p, w_hid_p, b_hid_p, w_out_p, b_out_p)


@functools.partial(jax.jit, static_argnames=("act_type", "compute_dtype", "bm"))
def _ode_func_forward(x, prepared, *, act_type, compute_dtype, bm):
    cdt = jnp.dtype(compute_dtype)
    if len(prepared) == 6:
        w_in, b_in, w_hid, b_hid, w_out, b_out = prepared
        L = w_hid.shape[0]
    else:
        w_in, b_in, w_out, b_out = prepared
        w_hid = b_hid = None
        L = 0

    B, D = x.shape
    Hp = w_in.shape[1]
    O = w_out.shape[1]

    # bf16 operand path: cast x in the wrapper (halves x HBM traffic / VMEM buffers).
    x_in = x.astype(cdt) if (cdt == jnp.bfloat16 and x.dtype != cdt) else x

    n_steps = pl.cdiv(B, bm)
    kernel = _make_kernel(act_type, L, cdt)

    # Weights never change across grid steps (constant index maps).  For large weights,
    # single-buffer them so the stacked hidden block doesn't double its VMEM footprint
    # (matters on v7x's 64 MiB VMEM at large H/L; irrelevant at tiny widths).
    w_bytes = (D * Hp + L * Hp * Hp + Hp * O) * cdt.itemsize
    single_buf = w_bytes > (8 << 20)

    def wspec(shape, idx):
        if single_buf:
            return pl.BlockSpec(shape, idx, pipeline_mode=pl.Buffered(1))
        return pl.BlockSpec(shape, idx)

    in_specs = [
        pl.BlockSpec((bm, D), lambda i: (i, 0)),   # x tile (last dim == full D: no pad)
        wspec((D, Hp), lambda i: (0, 0)),          # fc_in weight (VMEM-resident)
        wspec((1, Hp), lambda i: (0, 0)),          # fc_in bias
    ]
    args = [x_in, w_in, b_in]
    if L > 0:
        in_specs += [
            wspec((L, Hp, Hp), lambda i: (0, 0, 0)),   # hidden weights (stacked)
            wspec((L, 1, Hp), lambda i: (0, 0, 0)),    # hidden biases (stacked)
        ]
        args += [w_hid, b_hid]
    in_specs += [
        wspec((Hp, O), lambda i: (0, 0)),          # fc_out weight
        wspec((1, O), lambda i: (0, 0)),           # fc_out bias
    ]
    args += [w_out, b_out]

    # Size the scoped-VMEM limit to actual demand (+margin) instead of the whole chip.
    vmem_need = (2 * bm * D * jnp.dtype(x_in.dtype).itemsize      # x double buffer
                 + 2 * bm * O * jnp.dtype(x.dtype).itemsize        # out double buffer
                 + (1 if single_buf else 2) * w_bytes              # weight buffers
                 + 2 * (Hp + L * Hp + O) * 4                       # bias buffers (f32)
                 + 2 * bm * Hp * 4)                                # hidden intermediates
    vmem_limit = max(32 << 20, min(2 * int(vmem_need) + (8 << 20), 96 << 20))

    out = pl.pallas_call(
        kernel,
        out_shape=jax.ShapeDtypeStruct((B, O), x.dtype),
        grid=(n_steps,),
        in_specs=in_specs,
        out_specs=pl.BlockSpec((bm, O), lambda i: (i, 0)),  # last dim == full O: no slice
        compiler_params=pltpu.CompilerParams(
            dimension_semantics=("parallel",),
            vmem_limit_bytes=int(vmem_limit),
        ),
    )(*args)
    return out


def ode_func_nn_forward(t, x, prepared_params, *, act_type="Tanh",
                        compute_dtype=jnp.float32, bm=None):
    """Forward pass of ODEFuncNN. `t` is accepted (torchdiffeq convention) but unused.

    `prepared_params` must come from prepare_ode_func_params(); that call is done once
    outside the solver loop so no per-call padding/casting of weights happens here.
    """
    del t  # unused, as in the PyTorch module
    cdt = jnp.dtype(compute_dtype)
    sublane = 16 if cdt == jnp.bfloat16 else 8
    if bm is None:
        bm = _auto_bm(x.shape[0], sublane)
    bm = _round_up(bm, sublane)
    return _ode_func_forward(x, prepared_params, act_type=act_type,
                             compute_dtype=cdt, bm=bm)


def _reference_forward(x, params, act_type):
    act = ACT_MAP[act_type]
    w_in, b_in, w_hid, b_hid, w_out, b_out = params
    h = act(x @ w_in + b_in)
    for l in range(w_hid.shape[0]):
        h = act(h @ w_hid[l] + b_hid[l])
    return h @ w_out + b_out


if __name__ == "__main__":
    # Config consistent with the module: input_dim=16, n_hidden=32, n_layer=3
    # (-> 2 hidden layers), Tanh activation, output_dim defaults to input_dim.
    input_dim, n_hidden, n_layer, act_type = 16, 32, 3, "Tanh"
    batch = 16

    key = jax.random.PRNGKey(0)
    k_params, k_x = jax.random.split(key)
    params = init_ode_func_params(k_params, input_dim, n_hidden, n_layer)
    x = jax.random.normal(k_x, (batch, input_dim), jnp.float32)
    t = jnp.zeros((), jnp.float32)  # unused, per torchdiffeq convention

    # One-time parameter prep (hoisted out of the per-RHS-eval path).
    prepared = prepare_ode_func_params(params)

    # f32 path: numerics must match the plain-JAX reference (tight tol).
    out = jax.block_until_ready(ode_func_nn_forward(t, x, prepared, act_type=act_type))
    ref = _reference_forward(x, params, act_type)
    assert out.shape == (batch, input_dim)
    assert jnp.allclose(out, ref, atol=1e-5, rtol=1e-5), "f32 mismatch vs JAX reference"

    # bf16-MXU-operand path (f32 accumulate + f32 activations): looser tolerance.
    prepared_bf16 = prepare_ode_func_params(params, compute_dtype=jnp.bfloat16)
    out_bf16 = jax.block_until_ready(
        ode_func_nn_forward(t, x, prepared_bf16, act_type=act_type,
                            compute_dtype=jnp.bfloat16))
    assert jnp.allclose(out_bf16, ref, atol=5e-2, rtol=5e-2), "bf16 path drifted too far"

    # n_layer == 1 path (no hidden layers -> dedicated kernel, no dummy hidden block).
    params1 = init_ode_func_params(k_params, input_dim, n_hidden, 1)
    prepared1 = prepare_ode_func_params(params1)
    out1 = jax.block_until_ready(
        ode_func_nn_forward(t, x, prepared1, act_type="Softplus"))
    ref1 = _reference_forward(x, params1, "Softplus")
    assert jnp.allclose(out1, ref1, atol=1e-5, rtol=1e-5), "n_layer=1 path mismatch"

    print("KERNEL_OK")
</pallas_src>

<mosaic_0001>
module attributes {stable_mosaic.version = 11 : i64} {
  func.func @kernel(%arg0: i32, %arg1: memref<16x16xf32, #tpu.memory_space<vmem>>, %arg2: memref<16x128xf32, #tpu.memory_space<vmem>>, %arg3: memref<1x128xf32, #tpu.memory_space<vmem>>, %arg4: memref<2x128x128xf32, #tpu.memory_space<vmem>>, %arg5: memref<2x1x128xf32, #tpu.memory_space<vmem>>, %arg6: memref<128x16xf32, #tpu.memory_space<vmem>>, %arg7: memref<1x16xf32, #tpu.memory_space<vmem>>, %arg8: memref<16x16xf32, #tpu.memory_space<vmem>>) attributes {dimension_semantics = [#tpu.dimension_semantics<parallel>], iteration_bounds = array<i64: 1>, scalar_prefetch = 0 : i64, scratch_operands = 0 : i64, tpu.core_type = #tpu.core_type<tc>, window_params = [{transform_indices = @transform_0, window_bounds = array<i64: 16, 16>}, {pipeline_mode = #tpu.pipeline_mode<synchronous>, transform_indices = @transform_1, window_bounds = array<i64: 16, 128>}, {pipeline_mode = #tpu.pipeline_mode<synchronous>, transform_indices = @transform_2, window_bounds = array<i64: 1, 128>}, {pipeline_mode = #tpu.pipeline_mode<synchronous>, transform_indices = @transform_3, window_bounds = array<i64: 2, 128, 128>}, {pipeline_mode = #tpu.pipeline_mode<synchronous>, transform_indices = @transform_4, window_bounds = array<i64: 2, 1, 128>}, {pipeline_mode = #tpu.pipeline_mode<synchronous>, transform_indices = @transform_5, window_bounds = array<i64: 128, 16>}, {pipeline_mode = #tpu.pipeline_mode<synchronous>, transform_indices = @transform_6, window_bounds = array<i64: 1, 16>}, {transform_indices = @transform_7, window_bounds = array<i64: 16, 16>}]} {
    %c0 = arith.constant 0 : index
    %c0_0 = arith.constant 0 : index
    %0 = vector.load %arg1[%c0, %c0_0] : memref<16x16xf32, #tpu.memory_space<vmem>>, vector<16x16xf32>
    %c0_1 = arith.constant 0 : index
    %c0_2 = arith.constant 0 : index
    %1 = vector.load %arg2[%c0_1, %c0_2] : memref<16x128xf32, #tpu.memory_space<vmem>>, vector<16x128xf32>
    %cst = arith.constant dense<0.000000e+00> : vector<16x128xf32>
    %2 = tpu.matmul %0, %1, %cst {dimension_numbers = #tpu.dot_dimension_numbers<[1], [0], [0], [1], [0, 0, 1, 1], [], []>} : vector<16x16xf32>, vector<16x128xf32>, vector<16x128xf32> -> vector<16x128xf32>
    %c0_3 = arith.constant 0 : index
    %c0_4 = arith.constant 0 : index
    %3 = vector.load %arg3[%c0_3, %c0_4] : memref<1x128xf32, #tpu.memory_space<vmem>>, vector<1x128xf32>
    %4 = vector.broadcast %3 : vector<1x128xf32> to vector<16x128xf32>
    %5 = arith.addf %2, %4 : vector<16x128xf32>
    %6 = math.tanh %5 : vector<16x128xf32>
    %c0_5 = arith.constant 0 : index
    %c0_6 = arith.constant 0 : index
    %c0_7 = arith.constant 0 : index
    %7 = vector.load %arg4[%c0_5, %c0_6, %c0_7] : memref<2x128x128xf32, #tpu.memory_space<vmem>>, vector<1x128x128xf32>
    %8 = vector.shape_cast %7 : vector<1x128x128xf32> to vector<128x128xf32>
    %cst_8 = arith.constant dense<0.000000e+00> : vector<16x128xf32>
    %9 = tpu.matmul %6, %8, %cst_8 {dimension_numbers = #tpu.dot_dimension_numbers<[1], [0], [0], [1], [0, 0, 1, 1], [], []>} : vector<16x128xf32>, vector<128x128xf32>, vector<16x128xf32> -> vector<16x128xf32>
    %c0_9 = arith.constant 0 : index
    %c0_10 = arith.constant 0 : index
    %c0_11 = arith.constant 0 : index
    %10 = vector.load %arg5[%c0_9, %c0_10, %c0_11] : memref<2x1x128xf32, #tpu.memory_space<vmem>>, vector<1x1x128xf32>
    %11 = vector.shape_cast %10 : vector<1x1x128xf32> to vector<1x128xf32>
    %12 = vector.broadcast %11 : vector<1x128xf32> to vector<16x128xf32>
    %13 = arith.addf %9, %12 : vector<16x128xf32>
    %14 = math.tanh %13 : vector<16x128xf32>
    %c1 = arith.constant 1 : index
    %c0_12 = arith.constant 0 : index
    %c0_13 = arith.constant 0 : index
    %15 = vector.load %arg4[%c1, %c0_12, %c0_13] : memref<2x128x128xf32, #tpu.memory_space<vmem>>, vector<1x128x128xf32>
    %16 = vector.shape_cast %15 : vector<1x128x128xf32> to vector<128x128xf32>
    %cst_14 = arith.constant dense<0.000000e+00> : vector<16x128xf32>
    %17 = tpu.matmul %14, %16, %cst_14 {dimension_numbers = #tpu.dot_dimension_numbers<[1], [0], [0], [1], [0, 0, 1, 1], [], []>} : vector<16x128xf32>, vector<128x128xf32>, vector<16x128xf32> -> vector<16x128xf32>
    %c1_15 = arith.constant 1 : index
    %c0_16 = arith.constant 0 : index
    %c0_17 = arith.constant 0 : index
    %18 = vector.load %arg5[%c1_15, %c0_16, %c0_17] : memref<2x1x128xf32, #tpu.memory_space<vmem>>, vector<1x1x128xf32>
    %19 = vector.shape_cast %18 : vector<1x1x128xf32> to vector<1x128xf32>
    %20 = vector.broadcast %19 : vector<1x128xf32> to vector<16x128xf32>
    %21 = arith.addf %17, %20 : vector<16x128xf32>
    %22 = math.tanh %21 : vector<16x128xf32>
    %c0_18 = arith.constant 0 : index
    %c0_19 = arith.constant 0 : index
    %23 = vector.load %arg6[%c0_18, %c0_19] : memref<128x16xf32, #tpu.memory_space<vmem>>, vector<128x16xf32>
    %cst_20 = arith.constant dense<0.000000e+00> : vector<16x16xf32>
    %24 = tpu.matmul %22, %23, %cst_20 {dimension_numbers = #tpu.dot_dimension_numbers<[1], [0], [0], [1], [0, 0, 1, 1], [], []>} : vector<16x128xf32>, vector<128x16xf32>, vector<16x16xf32> -> vector<16x16xf32>
    %c0_21 = arith.constant 0 : index
    %c0_22 = arith.constant 0 : index
    %25 = vector.load %arg7[%c0_21, %c0_22] : memref<1x16xf32, #tpu.memory_space<vmem>>, vector<1x16xf32>
    %26 = vector.broadcast %25 : vector<1x16xf32> to vector<16x16xf32>
    %27 = arith.addf %24, %26 : vector<16x16xf32>
    %c0_23 = arith.constant 0 : index
    %c0_24 = arith.constant 0 : index
    %28 = vector.load %arg8[%c0_23, %c0_24] : memref<16x16xf32, #tpu.memory_space<vmem>>, vector<16x16xf32>
    tpu.vector_store %arg8[%c0_23, %c0_24], %27 {strides = array<i32>} : memref<16x16xf32, #tpu.memory_space<vmem>>, vector<16x16xf32>,
    return
  }
  func.func @transform_0(%arg0: i32) -> (i32, i32) {
    %c0_i32 = arith.constant 0 : i32
    %c0_i32_0 = arith.constant 0 : i32
    return %arg0, %c0_i32 : i32, i32
  }
  func.func @transform_1(%arg0: i32) -> (i32, i32) {
    %c0_i32 = arith.constant 0 : i32
    %c0_i32_0 = arith.constant 0 : i32
    %c0_i32_1 = arith.constant 0 : i32
    return %c0_i32, %c0_i32_0 : i32, i32
  }
  func.func @transform_2(%arg0: i32) -> (i32, i32) {
    %c0_i32 = arith.constant 0 : i32
    %c0_i32_0 = arith.constant 0 : i32
    %c0_i32_1 = arith.constant 0 : i32
    return %c0_i32, %c0_i32_0 : i32, i32
  }
  func.func @transform_3(%arg0: i32) -> (i32, i32, i32) {
    %c0_i32 = arith.constant 0 : i32
    %c0_i32_0 = arith.constant 0 : i32
    %c0_i32_1 = arith.constant 0 : i32
    %c0_i32_2 = arith.constant 0 : i32
    return %c0_i32, %c0_i32_0, %c0_i32_1 : i32, i32, i32
  }
  func.func @transform_4(%arg0: i32) -> (i32, i32, i32) {
    %c0_i32 = arith.constant 0 : i32
    %c0_i32_0 = arith.constant 0 : i32
    %c0_i32_1 = arith.constant 0 : i32
    %c0_i32_2 = arith.constant 0 : i32
    return %c0_i32, %c0_i32_0, %c0_i32_1 : i32, i32, i32
  }
  func.func @transform_5(%arg0: i32) -> (i32, i32) {
    %c0_i32 = arith.constant 0 : i32
    %c0_i32_0 = arith.constant 0 : i32
    %c0_i32_1 = arith.constant 0 : i32
    return %c0_i32, %c0_i32_0 : i32, i32
  }
  func.func @transform_6(%arg0: i32) -> (i32, i32) {
    %c0_i32 = arith.constant 0 : i32
    %c0_i32_0 = arith.constant 0 : i32
    %c0_i32_1 = arith.constant 0 : i32
    return %c0_i32, %c0_i32_0 : i32, i32
  }
  func.func @transform_7(%arg0: i32) -> (i32, i32) {
    %c0_i32 = arith.constant 0 : i32
    %c0_i32_0 = arith.constant 0 : i32
    return %arg0, %c0_i32 : i32, i32
  }
}

</mosaic_0001>

<bundles_post_ra>
// kernel: _ode_func_forward.1
= control target key start
LH: loop header
LB: loop body
LE: loop exit
PB: predicated region body
PF: predicated region fallthrough
CT: control target
= control target key end

     0   :  { %12 = vsyncpa [#allocation3], 0  ;;  %s824_s0 = inlined_call_operand.vmem [shape: f32[16,16], index: 0, kind: input, shape index: {}]   ;;  %s825_s1 = inlined_call_operand.vmem [shape: f32[16,128], index: 1, kind: input, shape index: {}]   ;;  %s826_s2 = inlined_call_operand.vmem [shape: f32[1,128], index: 2, kind: input, shape index: {}]   ;;  %s827_s3 = inlined_call_operand.hbm [shape: f32[2,128,128], index: 3, kind: input, shape index: {}]   ;;  %s828_s4 = inlined_call_operand.vmem [shape: f32[2,1,128], index: 4, kind: input, shape index: {}]   ;;  %s829_s5 = inlined_call_operand.vmem [shape: f32[128,16], index: 5, kind: input, shape index: {}]   ;;  %s830_s6 = inlined_call_operand.vmem [shape: f32[1,16], index: 6, kind: input, shape index: {}]   ;;  %s831_s7 = inlined_call_operand.hbm [shape: f32[16,16], index: 7, kind: output, shape index: {}]  }
   0x1   :  { %13 = vsyncpa [#allocation4], 0  ;;  %s692_s24 = smov [#allocation2]  }
   0x2   :  { %s25_s25 = sshll.u32 %s692_s24, 4  ;;  %s26_s25 = int_to_ptr.vmem [resolvable:$true] %s25_s25 }
   0x3   :  { %s656_s26 = scalar_lea.vmem %s26_s25, 4096  ;;  %p661_p1 = scmp.lt.s32.totalorder %s26_s25, %s26_s25 }
   0x4   :  { %p657_p0 = scmp.ne.s32.totalorder %s26_s25, %s656_s26  ;;  %p662_p2 = scmp.lt.s32.totalorder %s656_s26, %s656_s26 }
   0x6   :  { %p663_p3 = por %p662_p2, %p661_p1 }
   0x8   :  { %p664_p4 = pnand %p663_p3, %p657_p0 }
   0xa   :  { %667 = shalt.err (!%p664_p4)
}
   0xb   :  { %s693_s27 = smov 128   ;;  %s694_s28 = smov 8  }
   0xc   :  { %31 = dma.hbm_to_vmem [thread:$0]  %s827_s3, 4096, %s26_s25, [#allocation3], %s693_s27, %s693_s27, %s694_s28  }
   0xd   :  { %688 = dma.done.wait [#allocation3], 4096  }
   0xe   :  { %689 = vsyncadd [#allocation3], 4294963200  ;;  %vm52_vm0 = vcmask 130048   ;;  %v44_v0 = vld [vmem:[%s825_s1 + $0x8] sm:$0xff]  ;;  %v43_v1 = vld [vmem:[%s825_s1] sm:$0xff]  ;;  %s695_s26 = smov [#allocation5]  }
   0xf   :  { %v41_v2 = vld [vmem:[%s824_s0] sm:$0xff]  ;;  %520 = vmatprep.subr.mxu0 %v44_v0  ;;  %v151_v3 = vld [vmem:[#allocation2 + $0x78] sm:$0xff]  ;;  %v150_v4 = vld [vmem:[#allocation2 + $0x70] sm:$0xff]  ;;  %s443_s29 = sshll.u32 %s695_s26, 4  ;;  %s444_s29 = int_to_ptr.vmem [resolvable:$true] %s443_s29 }
  0x10   :  { %524 = vmatprep.mubr.msk.f32.mxu0 %vm52_vm0, %v41_v2  ;;  %521 = vmatpush3.msra.mxu0 %v44_v0  ;;  %v42_v5 = vld [vmem:[%s824_s0 + $0x8] sm:$0xff]  ;;  %v148_v7 = vld [vmem:[#allocation2 + $0x60] sm:$0xff]  ;;  %v147_v8 = vld [vmem:[#allocation2 + $0x58] sm:$0xff]  ;;  %p673_p6 = scmp.lt.s32.totalorder %s444_s29, %s444_s29 }
  0x11   :  { %527 = vmatprep.subr.mxu1 %v151_v3  ;;  %522 = vmatprep.subr.mxu0 %v43_v1  ;;  %v149_v6 = vld [vmem:[#allocation2 + $0x68] sm:$0xff]  ;;  %v146_v9 = vld [vmem:[#allocation2 + $0x50] sm:$0xff]  ;;  %v144_v11 = vld [vmem:[#allocation2 + $0x40] sm:$0xff] }
  0x12   :  { %528 = vmatpush3.msra.mxu1 %v151_v3  ;;  %523 = vmatpush3.msra.mxu0 %v43_v1  ;;  %v145_v10 = vld [vmem:[#allocation2 + $0x48] sm:$0xff]  ;;  %v143_v12 = vld [vmem:[#allocation2 + $0x38] sm:$0xff]  ;;  %v142_v13 = vld [vmem:[#allocation2 + $0x30] sm:$0xff] }
  0x13   :  { %529 = vmatprep.subr.mxu1 %v150_v4  ;;  %525 = vmatmul.mubr.msk.f32.vlgmr.msra.gmra.mxu0 %vm52_vm0, %v42_v5  ;;  %v141_v14 = vld [vmem:[#allocation2 + $0x28] sm:$0xff]  ;;  %v140_v15 = vld [vmem:[#allocation2 + $0x20] sm:$0xff]  ;;  %v139_v16 = vld [vmem:[#allocation2 + $0x18] sm:$0xff] }
  0x14   :  { %530 = vmatpush3.msra.mxu1 %v150_v4  ;;  %v138_v17 = vld [vmem:[#allocation2 + $0x10] sm:$0xff]  ;;  %v137_v18 = vld [vmem:[#allocation2 + $0x8] sm:$0xff]  ;;  %v136_v19 = vld [vmem:[#allocation2] sm:$0xff] }
  0x15   :  { %531 = vmatprep.subr.mxu1 %v149_v6  ;;  %v252_v20 = vld [vmem:[#allocation2 + $0xf8] sm:$0xff]  ;;  %v251_v21 = vld [vmem:[#allocation2 + $0xf0] sm:$0xff]  ;;  %v250_v22 = vld [vmem:[#allocation2 + $0xe8] sm:$0xff] }
  0x16   :  { %532 = vmatpush3.msra.mxu1 %v149_v6  ;;  %562 = vmatprep.subr.mxu0 %v252_v20  ;;  %v249_v23 = vld [vmem:[#allocation2 + $0xe0] sm:$0xff]  ;;  %v248_v24 = vld [vmem:[#allocation2 + $0xd8] sm:$0xff]  ;;  %v247_v25 = vld [vmem:[#allocation2 + $0xd0] sm:$0xff] }
  0x17   :  { %533 = vmatprep.subr.mxu1 %v148_v7  ;;  %563 = vmatpush3.msra.mxu0 %v252_v20  ;;  %v455_v26 = vld [vmem:[%s826_s2] ss:$0 sm:$0xff]  ;;  %v246_v33 = vld [vmem:[#allocation2 + $0xc8] sm:$0xff]  ;;  %v244_v35 = vld [vmem:[#allocation2 + $0xb8] sm:$0xff] }
  0x18   :  { %534 = vmatpush3.msra.mxu1 %v148_v7  ;;  %564 = vmatprep.subr.mxu0 %v251_v21  ;;  %v245_v34 = vld [vmem:[#allocation2 + $0xc0] sm:$0xff]  ;;  %v243_v36 = vld [vmem:[#allocation2 + $0xb0] sm:$0xff]  ;;  %v242_v37 = vld [vmem:[#allocation2 + $0xa8] sm:$0xff] }
  0x19   :  { %535 = vmatprep.subr.mxu1 %v147_v8  ;;  %565 = vmatpush3.msra.mxu0 %v251_v21  ;;  %v241_v38 = vld [vmem:[#allocation2 + $0xa0] sm:$0xff]  ;;  %v240_v39 = vld [vmem:[#allocation2 + $0x98] sm:$0xff]  ;;  %v239_v40 = vld [vmem:[#allocation2 + $0x90] sm:$0xff] }
  0x1a   :  { %536 = vmatpush3.msra.mxu1 %v147_v8  ;;  %566 = vmatprep.subr.mxu0 %v250_v22  ;;  %v238_v41 = vld [vmem:[#allocation2 + $0x88] sm:$0xff]  ;;  %v237_v42 = vld [vmem:[#allocation2 + $0x80] sm:$0xff]  ;;  %v353_v43 = vld [vmem:[%s829_s5 + $0x78] sm:$0xff] }
  0x1b   :  { %537 = vmatprep.subr.mxu1 %v146_v9  ;;  %567 = vmatpush3.msra.mxu0 %v250_v22  ;;  %v352_v44 = vld [vmem:[%s829_s5 + $0x70] sm:$0xff]  ;;  %v351_v45 = vld [vmem:[%s829_s5 + $0x68] sm:$0xff]  ;;  %v350_v46 = vld [vmem:[%s829_s5 + $0x60] sm:$0xff] }
  0x1c   :  { %538 = vmatpush3.msra.mxu1 %v146_v9  ;;  %568 = vmatprep.subr.mxu0 %v249_v23  ;;  %v349_v47 = vld [vmem:[%s829_s5 + $0x58] sm:$0xff]  ;;  %v348_v48 = vld [vmem:[%s829_s5 + $0x50] sm:$0xff]  ;;  %v458_v49 = vld [vmem:[%s828_s4] ss:$0 sm:$0xff] }
  0x1d   :  { %539 = vmatprep.subr.mxu1 %v145_v10  ;;  %569 = vmatpush3.msra.mxu0 %v249_v23  ;;  %v347_v56 = vld [vmem:[%s829_s5 + $0x48] sm:$0xff]  ;;  %v346_v57 = vld [vmem:[%s829_s5 + $0x40] sm:$0xff]  ;;  %v345_v58 = vld [vmem:[%s829_s5 + $0x38] sm:$0xff] }
  0x1e   :  { %540 = vmatpush3.msra.mxu1 %v145_v10  ;;  %570 = vmatprep.subr.mxu0 %v248_v24  ;;  %v344_v59 = vld [vmem:[%s829_s5 + $0x30] sm:$0xff]  ;;  %v343_v60 = vld [vmem:[%s829_s5 + $0x28] sm:$0xff]  ;;  %v342_v61 = vld [vmem:[%s829_s5 + $0x20] sm:$0xff] }
  0x1f   :  { %541 = vmatprep.subr.mxu1 %v144_v11  ;;  %571 = vmatpush3.msra.mxu0 %v248_v24  ;;  %v341_v62 = vld [vmem:[%s829_s5 + $0x18] sm:$0xff]  ;;  %v340_v63 = vld [vmem:[%s829_s5 + $0x10] sm:$0xff]  ;;  %v339_v0 = vld [vmem:[%s829_s5 + $0x8] sm:$0xff] }
  0x20   :  { %542 = vmatpush3.msra.mxu1 %v144_v11  ;;  %572 = vmatprep.subr.mxu0 %v247_v25  ;;  %v338_v1 = vld [vmem:[%s829_s5] sm:$0xff] }
  0x21   :  { %543 = vmatprep.subr.mxu1 %v143_v12  ;;  %573 = vmatpush3.msra.mxu0 %v247_v25  ;;  %v460_v2 = vld [vmem:[%s828_s4 + $0x1] ss:$0 sm:$0xff]  ;;  %v461_v9 = vld [vmem:[%s830_s6] ss:$0 sm:$0xff]  ;;  %s668_s4 = scalar_lea.vmem %s444_s29, 256 }
  0x22   :  { %544 = vmatpush3.msra.mxu1 %v143_v12  ;;  %574 = vmatprep.subr.mxu0 %v246_v33  ;;  %p669_p5 = scmp.ne.s32.totalorder %s444_s29, %s668_s4  ;;  %p674_p7 = scmp.lt.s32.totalorder %s668_s4, %s668_s4 }
  0x23   :  { %545 = vmatprep.subr.mxu1 %v142_v13  ;;  %575 = vmatpush3.msra.mxu0 %v246_v33 }
  0x24   :  { %546 = vmatpush3.msra.mxu1 %v142_v13  ;;  %576 = vmatprep.subr.mxu0 %v245_v34  ;;  %p675_p8 = por %p674_p7, %p673_p6 }
  0x25   :  { %547 = vmatprep.subr.mxu1 %v141_v14  ;;  %577 = vmatpush3.msra.mxu0 %v245_v34 }
  0x26   :  { %548 = vmatpush3.msra.mxu1 %v141_v14  ;;  %578 = vmatprep.subr.mxu0 %v244_v35  ;;  %p676_p9 = pnand %p675_p8, %p669_p5 }
  0x27   :  { %549 = vmatprep.subr.mxu1 %v140_v15  ;;  %579 = vmatpush3.msra.mxu0 %v244_v35 }
  0x28   :  { %550 = vmatpush3.msra.mxu1 %v140_v15  ;;  %580 = vmatprep.subr.mxu0 %v243_v36 }
  0x29   :  { %551 = vmatprep.subr.mxu1 %v139_v16  ;;  %581 = vmatpush3.msra.mxu0 %v243_v36 }
  0x2a   :  { %552 = vmatpush3.msra.mxu1 %v139_v16  ;;  %582 = vmatprep.subr.mxu0 %v242_v37 }
  0x2b   :  { %553 = vmatprep.subr.mxu1 %v138_v17  ;;  %583 = vmatpush3.msra.mxu0 %v242_v37 }
  0x2c   :  { %554 = vmatpush3.msra.mxu1 %v138_v17  ;;  %584 = vmatprep.subr.mxu0 %v241_v38 }
  0x2d   :  { %555 = vmatprep.subr.mxu1 %v137_v18  ;;  %585 = vmatpush3.msra.mxu0 %v241_v38 }
  0x2e   :  { %556 = vmatpush3.msra.mxu1 %v137_v18  ;;  %586 = vmatprep.subr.mxu0 %v240_v39 }
  0x2f   :  { %557 = vmatprep.subr.mxu1 %v136_v19  ;;  %587 = vmatpush3.msra.mxu0 %v240_v39 }
  0x30   :  { %558 = vmatpush3.msra.mxu1 %v136_v19  ;;  %588 = vmatprep.subr.mxu0 %v239_v40 }
  0x31   :  { %589 = vmatpush3.msra.mxu0 %v239_v40  ;;  %597 = vmatprep.subr.mxu1 %v353_v43 }
  0x32   :  { %590 = vmatprep.subr.mxu0 %v238_v41 }
  0x33   :  { %591 = vmatpush3.msra.mxu0 %v238_v41 }
  0x34   :  { %592 = vmatprep.subr.mxu0 %v237_v42 }
  0x35   :  { %593 = vmatpush3.msra.mxu0 %v237_v42 }
  0xd3   :  { %v526_v27 = vpop.f32.mrf.mxu0 }
  0xd4   :  { %v131_v28 = vadd.f32 %v526_v27, %v455_v26 }
  0xd5   :  { %v125_v29 = vpop.f32.mrf.mxu0 }
  0xd6   :  { %v126_v30 = vadd.f32 %v455_v26, %v125_v29 }
  0xd8   :  { %636 = vtanh.f32 %v126_v30 }
  0xd9   :  { %638 = vtanh.f32 %v131_v28 }
  0xe5   :  { %v637_v31 = vpop.eup %636 }
  0xe6   :  { %v639_v32 = vpop.eup %638  ;;  %559 = vmatprep.mubr.f32.mxu1 %v637_v31 }
  0xe7   :  { %560 = vmatmul.mubr.f32.vlgmr.msra.gmra.mxu1 %v639_v32 }
  0xe8   :  { %598 = vmatpush3.msra.mxu1 %v353_v43 }
  0xe9   :  { %599 = vmatprep.subr.mxu1 %v352_v44 }
  0xea   :  { %600 = vmatpush3.msra.mxu1 %v352_v44 }
  0xeb   :  { %601 = vmatprep.subr.mxu1 %v351_v45 }
  0xec   :  { %602 = vmatpush3.msra.mxu1 %v351_v45 }
  0xed   :  { %603 = vmatprep.subr.mxu1 %v350_v46 }
  0xee   :  { %604 = vmatpush3.msra.mxu1 %v350_v46 }
  0xef   :  { %605 = vmatprep.subr.mxu1 %v349_v47 }
  0xf0   :  { %606 = vmatpush3.msra.mxu1 %v349_v47 }
  0xf1   :  { %607 = vmatprep.subr.mxu1 %v348_v48 }
  0xf2   :  { %608 = vmatpush3.msra.mxu1 %v348_v48 }
  0xf3   :  { %609 = vmatprep.subr.mxu1 %v347_v56 }
  0xf4   :  { %610 = vmatpush3.msra.mxu1 %v347_v56 }
  0xf5   :  { %611 = vmatprep.subr.mxu1 %v346_v57 }
  0xf6   :  { %612 = vmatpush3.msra.mxu1 %v346_v57 }
  0xf7   :  { %613 = vmatprep.subr.mxu1 %v345_v58 }
  0xf8   :  { %614 = vmatpush3.msra.mxu1 %v345_v58 }
  0xf9   :  { %615 = vmatprep.subr.mxu1 %v344_v59 }
  0xfa   :  { %616 = vmatpush3.msra.mxu1 %v344_v59 }
  0xfb   :  { %617 = vmatprep.subr.mxu1 %v343_v60 }
  0xfc   :  { %618 = vmatpush3.msra.mxu1 %v343_v60 }
  0xfd   :  { %619 = vmatprep.subr.mxu1 %v342_v61 }
  0xfe   :  { %620 = vmatpush3.msra.mxu1 %v342_v61 }
  0xff   :  { %621 = vmatprep.subr.mxu1 %v341_v62 }
 0x100   :  { %622 = vmatpush3.msra.mxu1 %v341_v62 }
 0x101   :  { %623 = vmatprep.subr.mxu1 %v340_v63 }
 0x102   :  { %624 = vmatpush3.msra.mxu1 %v340_v63 }
 0x103   :  { %625 = vmatprep.subr.mxu1 %v339_v0 }
 0x104   :  { %626 = vmatpush3.msra.mxu1 %v339_v0 }
 0x105   :  { %627 = vmatprep.subr.mxu1 %v338_v1 }
 0x106   :  { %628 = vmatpush3.msra.mxu1 %v338_v1 }
 0x1a7   :  { %v561_v50 = vpop.f32.mrf.mxu1 }
 0x1a8   :  { %v231_v51 = vadd.f32 %v561_v50, %v458_v49 }
 0x1a9   :  { %v225_v52 = vpop.f32.mrf.mxu1 }
 0x1aa   :  { %v226_v53 = vadd.f32 %v458_v49, %v225_v52 }
 0x1ac   :  { %640 = vtanh.f32 %v226_v53 }
 0x1ad   :  { %642 = vtanh.f32 %v231_v51 }
 0x1b9   :  { %v641_v54 = vpop.eup %640 }
 0x1ba   :  { %v643_v55 = vpop.eup %642  ;;  %594 = vmatprep.mubr.f32.mxu0 %v641_v54 }
 0x1bb   :  { %595 = vmatmul.mubr.f32.vlgmr.msra.gmra.mxu0 %v643_v55 }
 0x27b   :  { %v596_v3 = vpop.f32.mrf.mxu0 }
 0x27c   :  { %v333_v4 = vadd.f32 %v596_v3, %v460_v2 }
 0x27d   :  { %v327_v5 = vpop.f32.mrf.mxu0 }
 0x27e   :  { %v328_v6 = vadd.f32 %v460_v2, %v327_v5 }
 0x280   :  { %644 = vtanh.f32 %v328_v6 }
 0x281   :  { %646 = vtanh.f32 %v333_v4 }
 0x28d   :  { %v645_v7 = vpop.eup %644 }
 0x28e   :  { %v647_v8 = vpop.eup %646  ;;  %629 = vmatprep.mubr.f32.mxu1 %v645_v7 }
 0x28f   :  { %630 = vmatmul.mubr.f32.vlgmr.msra.gmra.mxu1 %v647_v8 }
 0x34f   :  { %v631_v10 = vpop.f32.mrf.mxu1 }
 0x350   :  { %v433_v11 = vadd.f32 %v631_v10, %v461_v9 }
 0x351   :  { %v427_v12 = vpop.f32.mrf.mxu1 }
 0x352   :  { %437 = vst.msk [vmem:[#allocation5 + $0x8] sm:$0xff] %vm52_vm0, %v433_v11  ;;  %v428_v13 = vadd.f32 %v461_v9, %v427_v12 }
 0x354   :  { %436 = vst.msk [vmem:[#allocation5] sm:$0xff] %vm52_vm0, %v428_v13 }
 0x355   :  { %679 = shalt.err (!%p676_p9)
}
 0x356   :  { %449 = dma.vmem_to_hbm [thread:$0]  %s444_s29, 256, %s831_s7, [#allocation4], %s693_s27, %s693_s27, %s694_s28  }
 0x357   :  { %690 = dma.done.wait [#allocation4], 256  }
 0x358   :  { %691 = vsyncadd [#allocation4], 4294967040 }
 0x359   :  { %453 = vsyncpa [#allocation3], 1 }
 0x35a   :  { %454 = vsyncpa [#allocation4], 1 }

</bundles_post_ra>
